<compile_context>
chip_gen: v5e
topology: v5e:2x2
jax: 0.10.0
libtpu: 0.0.40
codegen_flags: <defaults>
</compile_context>

<pallas_src>
import functools

import jax
import jax.numpy as jnp
from jax.experimental import pallas as pl
from jax.experimental.pallas import tpu as pltpu

# ---------------- LoRA dims (small, consistent with the module) ----------------
BATCH = 2
SEQ = 8            # leading dims are flattened to M = BATCH*SEQ rows
IN_DIM = 128       # lane-aligned contraction dim
RANK = 8
OUT_DIM = 128      # lane-dense output
ALPHA = 16.0


def _lora_kernel(x_ref, a_ref, b_ref, out_ref, *, scale):
    """out = scale * (x @ A) @ B  -- two small MXU matmuls, f32 accumulation."""
    x = x_ref[...]                                     # (M, in_dim)   f32
    a = a_ref[...].astype(jnp.float32)                 # (in_dim, rank)  stored bf16
    b = b_ref[...].astype(jnp.float32)                 # (rank, out_dim) stored bf16

    xa = jnp.dot(x, a, preferred_element_type=jnp.float32)     # (M, rank)
    xa = xa * scale                                    # scale the tiny low-rank intermediate
    out = jnp.dot(xa, b, preferred_element_type=jnp.float32)   # (M, out_dim)
    out_ref[...] = out.astype(out_ref.dtype)


def lora_forward(x, a, b, *, alpha, rank):
    """x: (..., in_dim); A: (in_dim, rank); B: (rank, out_dim) -> (..., out_dim)."""
    in_dim, r = a.shape
    out_dim = b.shape[1]
    lead = x.shape[:-1]
    m = 1
    for s in lead:
        m *= s
    x2 = x.reshape(m, in_dim).astype(jnp.float32)
    scale = float(alpha) / float(rank)

    vmem = pl.BlockSpec(memory_space=pltpu.MemorySpace.VMEM)
    flops = 2 * m * in_dim * r + 2 * m * r * out_dim
    bytes_accessed = (x2.size * x2.dtype.itemsize
                      + a.size * a.dtype.itemsize
                      + b.size * b.dtype.itemsize
                      + m * out_dim * 4)

    out2 = pl.pallas_call(
        functools.partial(_lora_kernel, scale=scale),
        out_shape=jax.ShapeDtypeStruct((m, out_dim), jnp.float32),
        in_specs=[vmem, vmem, vmem],
        out_specs=vmem,
        compiler_params=pltpu.CompilerParams(vmem_limit_bytes=8 << 20),
        cost_estimate=pl.CostEstimate(
            flops=flops, transcendentals=0, bytes_accessed=bytes_accessed),
    )(x2, a, b)
    return out2.reshape(*lead, out_dim)


def reference_forward(x, a, b, *, alpha, rank):
    """Pure-JAX reference (same bf16-stored factors, f32 math)."""
    scale = alpha / rank
    a32 = a.astype(jnp.float32)
    b32 = b.astype(jnp.float32)
    xa = jnp.matmul(x, a32, precision=jax.lax.Precision.HIGHEST)
    return scale * jnp.matmul(xa, b32, precision=jax.lax.Precision.HIGHEST)


if __name__ == "__main__":
    key = jax.random.PRNGKey(0)
    kx, ka, kb = jax.random.split(key, 3)
    x = jax.random.normal(kx, (BATCH, SEQ, IN_DIM), jnp.float32)

    # Module init is A ~ randn, B = zeros.  We use a small random B here so the
    # correctness check exercises the full datapath instead of comparing zeros;
    # forward semantics are identical.
    a = jax.random.normal(ka, (IN_DIM, RANK), jnp.float32)
    b = 0.02 * jax.random.normal(kb, (RANK, OUT_DIM), jnp.float32)

    # perf: store LoRA factors as bf16 (kernel still accumulates in f32)
    a_bf16 = a.astype(jnp.bfloat16)
    b_bf16 = b.astype(jnp.bfloat16)

    out = lora_forward(x, a_bf16, b_bf16, alpha=ALPHA, rank=RANK)
    out = jax.block_until_ready(out)

    ref = reference_forward(x, a_bf16, b_bf16, alpha=ALPHA, rank=RANK)
    assert out.shape == (BATCH, SEQ, OUT_DIM), out.shape
    assert jnp.allclose(out, ref, atol=1e-3, rtol=1e-3), float(
        jnp.max(jnp.abs(out - ref)))
    print("KERNEL_OK")
</pallas_src>

<mosaic_0001>
module attributes {stable_mosaic.version = 11 : i64} {
  func.func @_lora_kernel(%arg0: memref<16x128xf32, #tpu.memory_space<vmem>>, %arg1: memref<128x8xbf16, #tpu.memory_space<vmem>>, %arg2: memref<8x128xbf16, #tpu.memory_space<vmem>>, %arg3: memref<16x128xf32, #tpu.memory_space<vmem>>) attributes {dimension_semantics = [], scalar_prefetch = 0 : i64, scratch_operands = 0 : i64, tpu.core_type = #tpu.core_type<tc>} {
    %c0 = arith.constant 0 : index
    %c0_0 = arith.constant 0 : index
    %0 = vector.load %arg0[%c0, %c0_0] : memref<16x128xf32, #tpu.memory_space<vmem>>, vector<16x128xf32>
    %c0_1 = arith.constant 0 : index
    %c0_2 = arith.constant 0 : index
    %1 = vector.load %arg1[%c0_1, %c0_2] : memref<128x8xbf16, #tpu.memory_space<vmem>>, vector<128x8xbf16>
    %2 = arith.extf %1 : vector<128x8xbf16> to vector<128x8xf32>
    %c0_3 = arith.constant 0 : index
    %c0_4 = arith.constant 0 : index
    %3 = vector.load %arg2[%c0_3, %c0_4] : memref<8x128xbf16, #tpu.memory_space<vmem>>, vector<8x128xbf16>
    %4 = arith.extf %3 : vector<8x128xbf16> to vector<8x128xf32>
    %cst = arith.constant dense<0.000000e+00> : vector<16x8xf32>
    %5 = tpu.matmul %0, %2, %cst {dimension_numbers = #tpu.dot_dimension_numbers<[1], [0], [0], [1], [0, 0, 1, 1], [], []>} : vector<16x128xf32>, vector<128x8xf32>, vector<16x8xf32> -> vector<16x8xf32>
    %cst_5 = arith.constant 2.000000e+00 : f32
    %6 = vector.broadcast %cst_5 : f32 to vector<16x8xf32>
    %7 = arith.mulf %5, %6 : vector<16x8xf32>
    %cst_6 = arith.constant dense<0.000000e+00> : vector<16x128xf32>
    %8 = tpu.matmul %7, %4, %cst_6 {dimension_numbers = #tpu.dot_dimension_numbers<[1], [0], [0], [1], [0, 0, 1, 1], [], []>} : vector<16x8xf32>, vector<8x128xf32>, vector<16x128xf32> -> vector<16x128xf32>
    %c0_7 = arith.constant 0 : index
    %c0_8 = arith.constant 0 : index
    %9 = vector.load %arg3[%c0_7, %c0_8] : memref<16x128xf32, #tpu.memory_space<vmem>>, vector<16x128xf32>
    tpu.vector_store %arg3[%c0_7, %c0_8], %8 {strides = array<i32>} : memref<16x128xf32, #tpu.memory_space<vmem>>, vector<16x128xf32>,
    return
  }
}

</mosaic_0001>

<bundles_post_ra>
// kernel: tpu_custom_call.1
= control target key start
LH: loop header
LB: loop body
LE: loop exit
PB: predicated region body
PF: predicated region fallthrough
CT: control target
= control target key end

     0   :  { %s271_s0 = inlined_call_operand.vmem [shape: f32[16,128], index: 0, kind: input, shape index: {}]   ;;  %s272_s1 = inlined_call_operand.vmem [shape: bf16[128,8], index: 1, kind: input, shape index: {}]   ;;  %s273_s2 = inlined_call_operand.vmem [shape: bf16[8,128], index: 2, kind: input, shape index: {}]   ;;  %s274_s3 = inlined_call_operand.hbm [shape: f32[16,128], index: 3, kind: output, shape index: {}]  }
   0x1   :  { %v166_v0 = vld [vmem:[%s272_s1 + $0x38] sm:$0xff]   ;;  %v165_v1 = vld [vmem:[%s272_s1 + $0x30] sm:$0xff]  }
   0x2   :  { %v159_v2 = vunpack.c.h.bf16 %v166_v0  ;;  %v158_v3 = vunpack.c.l.bf16 %v166_v0  ;;  %v155_v4 = vunpack.c.h.bf16 %v165_v1 }
   0x4   :  { %51 = vmatpush.msra.mxu0 %v159_v2  ;;  %167 = vmatpush.msra.mxu2 %v159_v2 }
   0x5   :  { %8 = vsyncpa [#allocation3], 0  ;;  %v164_v5 = vld [vmem:[%s272_s1 + $0x28] sm:$0xff]   ;;  %v154_v6 = vunpack.c.l.bf16 %v165_v1  ;;  %v163_v8 = vld [vmem:[%s272_s1 + $0x20] sm:$0xff]   ;;  %vm76_vm0 = vcmask 64512   ;;  %s114_s9 = sshll.u32 %s274_s3, 4  ;;  %s115_s9 = int_to_ptr.hbm [resolvable:$true] %s114_s9 }
   0x6   :  { %52 = vmatpush.msra.mxu0 %v158_v3  ;;  %168 = vmatpush.msra.mxu2 %v158_v3  ;;  %v151_v7 = vunpack.c.h.bf16 %v164_v5  ;;  %v150_v9 = vunpack.c.l.bf16 %v164_v5  ;;  %v147_v10 = vunpack.c.h.bf16 %v163_v8  ;;  %v162_v11 = vld [vmem:[%s272_s1 + $0x18] sm:$0xff]   ;;  %v146_v12 = vunpack.c.l.bf16 %v163_v8  ;;  %v161_v14 = vld [vmem:[%s272_s1 + $0x10] sm:$0xff]   ;;  %v160_v17 = vld [vmem:[%s272_s1 + $0x8] sm:$0xff]   ;;  %s214_s10 = smov 8  }
   0x7   :  { %v143_v13 = vunpack.c.h.bf16 %v162_v11  ;;  %v142_v15 = vunpack.c.l.bf16 %v162_v11  ;;  %v139_v16 = vunpack.c.h.bf16 %v161_v14  ;;  %v138_v18 = vunpack.c.l.bf16 %v161_v14  ;;  %v129_v20 = vld [vmem:[%s272_s1] sm:$0xff]   ;;  %v16_v25 = vld [vmem:[%s271_s0 + $0x8] sm:$0xff] }
   0x8   :  { %53 = vmatpush.msra.mxu0 %v155_v4  ;;  %169 = vmatpush.msra.mxu2 %v155_v4  ;;  %v135_v19 = vunpack.c.h.bf16 %v160_v17  ;;  %v134_v21 = vunpack.c.l.bf16 %v160_v17  ;;  %v131_v22 = vunpack.c.h.bf16 %v129_v20  ;;  %v130_v23 = vunpack.c.l.bf16 %v129_v20  ;;  %v15_v24 = vld [vmem:[%s271_s0] sm:$0xff]  ;;  %s212_s0 = smov [#allocation2]  }
   0x9   :  { %v49_v26 = vld [vmem:[%s273_s2] sm:$0xf]  ;;  %s112_s6 = sshll.u32 %s212_s0, 4  ;;  %s213_s2 = smov 128   ;;  %s113_s6 = int_to_ptr.vmem [resolvable:$true] %s112_s6 }
   0xa   :  { %54 = vmatpush.msra.mxu0 %v154_v6  ;;  %170 = vmatpush.msra.mxu2 %v154_v6  ;;  %v50_v27 = vunpack.c.l.bf16 %v49_v26 }
   0xc   :  { %55 = vmatpush.msra.mxu0 %v151_v7  ;;  %171 = vmatpush.msra.mxu2 %v151_v7 }
   0xd   :  { %98 = vmatpush.msra.mxu1 %v50_v27 }
   0xe   :  { %56 = vmatpush.msra.mxu0 %v150_v9  ;;  %172 = vmatpush.msra.mxu2 %v150_v9 }
  0x10   :  { %57 = vmatpush.msra.mxu0 %v147_v10  ;;  %173 = vmatpush.msra.mxu2 %v147_v10 }
  0x12   :  { %58 = vmatpush.msra.mxu0 %v146_v12  ;;  %174 = vmatpush.msra.mxu2 %v146_v12 }
  0x14   :  { %59 = vmatpush.msra.mxu0 %v143_v13  ;;  %175 = vmatpush.msra.mxu2 %v143_v13 }
  0x16   :  { %60 = vmatpush.msra.mxu0 %v142_v15  ;;  %176 = vmatpush.msra.mxu2 %v142_v15 }
  0x18   :  { %61 = vmatpush.msra.mxu0 %v139_v16  ;;  %177 = vmatpush.msra.mxu2 %v139_v16 }
  0x1a   :  { %62 = vmatpush.msra.mxu0 %v138_v18  ;;  %178 = vmatpush.msra.mxu2 %v138_v18 }
  0x1c   :  { %63 = vmatpush.msra.mxu0 %v135_v19  ;;  %179 = vmatpush.msra.mxu2 %v135_v19 }
  0x1e   :  { %64 = vmatpush.msra.mxu0 %v134_v21  ;;  %180 = vmatpush.msra.mxu2 %v134_v21 }
  0x20   :  { %65 = vmatpush.msra.mxu0 %v131_v22  ;;  %181 = vmatpush.msra.mxu2 %v131_v22 }
  0x22   :  { %66 = vmatpush.msra.mxu0 %v130_v23  ;;  %182 = vmatpush.msra.mxu2 %v130_v23 }
  0x23   :  { %67 = vmatmul.f32.vlgmr.msra.gmra.mxu0 %v15_v24  ;;  %70 = vmatmul.f32.vlgmr.msra.gmra.mxu2 %v16_v25 }
  0xa0   :  { %v68_v28 = vpop.f32.mrf.mxu0 }
  0xa1   :  { %v74_v29 = vmul.f32 2.0, %v68_v28 }
  0xa3   :  { %126 = vmatmul.msk.f32.vlgmr.msra.gmra.mxu1 %vm76_vm0, %v74_v29 }
  0xa6   :  { %v71_v30 = vpop.f32.mrf.mxu2 }
  0xa7   :  { %v75_v31 = vmul.f32 2.0, %v71_v30 }
  0xab   :  { %127 = vmatmul.msk.f32.gmra.mxu1 %vm76_vm0, %v75_v31 }
 0x120   :  { %v100_v32 = vpop.f32.mrf.mxu1 }
 0x121   :  { %106 = vst [vmem:[#allocation2] sm:$0xff] %v100_v32 }
 0x128   :  { %v103_v33 = vpop.f32.mrf.mxu1 }
 0x129   :  { %107 = vst [vmem:[#allocation2 + $0x8] sm:$0xff] %v103_v33 }
 0x12a   :  { %120 = dma.vmem_to_hbm [thread:$0]  %s113_s6, 256, %s115_s9, [#allocation3], %s213_s2, %s213_s2, %s214_s10  }
 0x12b   :  { %210 = dma.done.wait [#allocation3], 256  }
 0x12c   :  { %211 = vsyncadd [#allocation3], 4294967040 }
 0x12d   :  { %125 = vsyncpa [#allocation3], 1 }

</bundles_post_ra>
